<compile_context>
chip_gen: v7x
topology: tpu7x:2x2x1
jax: 0.10.0
libtpu: 0.0.40
codegen_flags: <defaults>
</compile_context>

<pallas_src>
import functools

import jax
import jax.numpy as jnp
from jax.experimental import pallas as pl
from jax.experimental.pallas import tpu as pltpu

EMB_DIM = 128
N_TOKENS = 6                       # each example is 6 token ids
IN_FEATURES = N_TOKENS * EMB_DIM   # 768
HID = 128


def _fused_kernel(ids_ref, emb_ref, w1_ref, b1_ref, w2_ref, b2_ref, o_ref):
    # ids_ref: VMEM (block_b, 6) int32
    # emb_ref: VMEM (W_pad, 128) f32      (resident, zero-padded rows)
    # w1_ref:  VMEM (768, 128) bf16       (resident)
    # b1_ref:  VMEM (1, 128) f32
    # w2_ref:  VMEM (128, out_pad) bf16   (resident, zero-padded cols)
    # b2_ref:  VMEM (1, out_pad) f32
    # o_ref:   VMEM (block_b, out_pad) f32
    ids = ids_ref[...]                                   # (block_b, 6)
    block_b = ids.shape[0]
    w_pad = emb_ref.shape[0]
    emb = emb_ref[...]                                   # (W_pad, 128) f32

    # One-hot MXU gather per token position (exact: 0/1 * f32, f32 accumulate).
    iota = jax.lax.broadcasted_iota(jnp.int32, (block_b, w_pad), 1)
    chunks = []
    for p in range(N_TOKENS):                            # static unroll (6)
        tok = ids[:, p:p + 1]                            # (block_b, 1)
        onehot = (iota == tok).astype(jnp.float32)       # (block_b, W_pad)
        chunks.append(jnp.dot(onehot, emb,
                              preferred_element_type=jnp.float32))
    x = jnp.concatenate(chunks, axis=1)                  # (block_b, 768) f32

    # Linear1 + ReLU (bf16 MXU inputs, f32 accumulate, f32 elementwise).
    h = jnp.dot(x.astype(jnp.bfloat16), w1_ref[...],
                preferred_element_type=jnp.float32) + b1_ref[...]
    h = jnp.maximum(h, 0.0)

    # Linear2 (lane-dense padded output).
    y = jnp.dot(h.astype(jnp.bfloat16), w2_ref[...],
                preferred_element_type=jnp.float32) + b2_ref[...]
    o_ref[...] = y.astype(o_ref.dtype)


def dependency_mlp_fused(inputs, emb_pad, w1_bf, b1, w2_pad_bf, b2_pad, *, block_b=8):
    """Fused embedding-gather + Linear1 + ReLU + Linear2.

    inputs: (B, 6) int32 token ids.  Returns (B, out_pad) f32 padded logits.
    """
    B = inputs.shape[0]
    nb = pl.cdiv(B, block_b)
    B_pad = nb * block_b
    if B_pad != B:
        inputs = jnp.pad(inputs, ((0, B_pad - B), (0, 0)))
    ids = inputs.astype(jnp.int32)

    w_pad = emb_pad.shape[0]
    out_pad = w2_pad_bf.shape[1]

    grid_spec = pltpu.PrefetchScalarGridSpec(
        num_scalar_prefetch=0,
        grid=(nb,),
        in_specs=[
            pl.BlockSpec((block_b, N_TOKENS), lambda i: (i, 0)),   # ids (per block)
            pl.BlockSpec((w_pad, EMB_DIM),    lambda i: (0, 0)),   # emb (resident)
            pl.BlockSpec((IN_FEATURES, HID),  lambda i: (0, 0)),   # w1 (resident)
            pl.BlockSpec((1, HID),            lambda i: (0, 0)),   # b1
            pl.BlockSpec((HID, out_pad),      lambda i: (0, 0)),   # w2 (resident)
            pl.BlockSpec((1, out_pad),        lambda i: (0, 0)),   # b2
        ],
        out_specs=pl.BlockSpec((block_b, out_pad), lambda i: (i, 0)),
    )

    flops = (2 * B_pad * N_TOKENS * w_pad * EMB_DIM       # one-hot gather matmuls
             + 2 * B_pad * IN_FEATURES * HID
             + 2 * B_pad * HID * out_pad)
    bytes_accessed = (ids.size * 4 + emb_pad.size * 4 + w1_bf.size * 2
                      + b1.size * 4 + w2_pad_bf.size * 2 + b2_pad.size * 4
                      + B_pad * out_pad * 4)

    out = pl.pallas_call(
        _fused_kernel,
        out_shape=jax.ShapeDtypeStruct((B_pad, out_pad), jnp.float32),
        grid_spec=grid_spec,
        compiler_params=pltpu.CompilerParams(
            dimension_semantics=("parallel",)),
        cost_estimate=pl.CostEstimate(
            flops=flops, transcendentals=0, bytes_accessed=bytes_accessed),
    )(ids, emb_pad, w1_bf, b1, w2_pad_bf, b2_pad)
    return out[:B]


@functools.partial(jax.jit, static_argnames=("outputs", "block_b"))
def dependency_model_forward(inputs, params, outputs, block_b=8):
    """inputs: int32 (batch, 6) token ids.  Returns logits (batch, outputs)."""
    emb = params["emb_pad"]                           # f32, resident in VMEM
    w1 = params["w1"].astype(jnp.bfloat16)
    b1 = params["b1"]
    w2 = params["w2_pad"].astype(jnp.bfloat16)        # zero-padded to 128 lanes
    b2 = params["b2_pad"]
    logits_pad = dependency_mlp_fused(inputs, emb, w1, b1, w2, b2, block_b=block_b)
    return logits_pad[:, :outputs]


def init_params(key, word_types, outputs):
    k_emb, k_w1, k_b1, k_w2, k_b2 = jax.random.split(key, 5)
    # Embedding ~ N(0,1) (torch.nn.Embedding default).
    embedding = jax.random.normal(k_emb, (word_types, EMB_DIM), dtype=jnp.float32)
    # Linear: U(-1/sqrt(in), 1/sqrt(in)) (torch.nn.Linear default), stored as (in, out).
    lim1 = 1.0 / jnp.sqrt(float(IN_FEATURES))
    w1 = jax.random.uniform(k_w1, (IN_FEATURES, HID), jnp.float32, -lim1, lim1)
    b1 = jax.random.uniform(k_b1, (1, HID), jnp.float32, -lim1, lim1)
    lim2 = 1.0 / jnp.sqrt(float(HID))
    w2 = jax.random.uniform(k_w2, (HID, outputs), jnp.float32, -lim2, lim2)
    b2 = jax.random.uniform(k_b2, (1, outputs), jnp.float32, -lim2, lim2)
    # Pad vocab rows to a multiple of 8 sublanes (zero rows) for aligned gather matmuls.
    w_pad = ((word_types + 7) // 8) * 8
    emb_pad = jnp.zeros((w_pad, EMB_DIM), jnp.float32).at[:word_types, :].set(embedding)
    # Pad the output dim up to a multiple of 128 with zeros (lane-dense stores).
    out_pad = ((outputs + 127) // 128) * 128
    w2_pad = jnp.zeros((HID, out_pad), jnp.float32).at[:, :outputs].set(w2)
    b2_pad = jnp.zeros((1, out_pad), jnp.float32).at[:, :outputs].set(b2)
    return {"emb_pad": emb_pad, "w1": w1, "b1": b1,
            "w2_pad": w2_pad, "b2_pad": b2_pad}


if __name__ == "__main__":
    key = jax.random.PRNGKey(0)
    word_types = 50
    outputs = 91          # e.g. number of parser actions
    batch = 8

    k_params, k_inputs = jax.random.split(key)
    params = init_params(k_params, word_types, outputs)
    inputs = jax.random.randint(k_inputs, (batch, N_TOKENS), 0, word_types,
                                dtype=jnp.int32)

    logits = dependency_model_forward(inputs, params, outputs, block_b=batch)
    jax.block_until_ready(logits)
    assert logits.shape == (batch, outputs)

    # Reference in plain JAX with the same bf16 matmul inputs / f32 accumulate.
    emb_rows = jnp.take(params["emb_pad"], inputs, axis=0).reshape(batch, IN_FEATURES)
    w1_bf = params["w1"].astype(jnp.bfloat16)
    w2_bf = params["w2_pad"].astype(jnp.bfloat16)
    h_ref = jnp.maximum(
        jnp.dot(emb_rows.astype(jnp.bfloat16), w1_bf,
                preferred_element_type=jnp.float32) + params["b1"], 0.0)
    ref = (jnp.dot(h_ref.astype(jnp.bfloat16), w2_bf,
                   preferred_element_type=jnp.float32) + params["b2_pad"])[:, :outputs]
    assert jnp.allclose(logits, ref, atol=1e-2, rtol=1e-2)

    print("KERNEL_OK")
</pallas_src>

<mosaic_0001>
module attributes {stable_mosaic.version = 11 : i64} {
  func.func @_fused_kernel(%arg0: i32, %arg1: memref<8x6xi32, #tpu.memory_space<vmem>>, %arg2: memref<56x128xf32, #tpu.memory_space<vmem>>, %arg3: memref<768x128xbf16, #tpu.memory_space<vmem>>, %arg4: memref<1x128xf32, #tpu.memory_space<vmem>>, %arg5: memref<128x128xbf16, #tpu.memory_space<vmem>>, %arg6: memref<1x128xf32, #tpu.memory_space<vmem>>, %arg7: memref<8x128xf32, #tpu.memory_space<vmem>>) attributes {dimension_semantics = [#tpu.dimension_semantics<parallel>], iteration_bounds = array<i64: 1>, scalar_prefetch = 0 : i64, scratch_operands = 0 : i64, tpu.core_type = #tpu.core_type<tc>, window_params = [{transform_indices = @transform_0, window_bounds = array<i64: 8, 6>}, {pipeline_mode = #tpu.pipeline_mode<synchronous>, transform_indices = @transform_1, window_bounds = array<i64: 56, 128>}, {pipeline_mode = #tpu.pipeline_mode<synchronous>, transform_indices = @transform_2, window_bounds = array<i64: 768, 128>}, {pipeline_mode = #tpu.pipeline_mode<synchronous>, transform_indices = @transform_3, window_bounds = array<i64: 1, 128>}, {pipeline_mode = #tpu.pipeline_mode<synchronous>, transform_indices = @transform_4, window_bounds = array<i64: 128, 128>}, {pipeline_mode = #tpu.pipeline_mode<synchronous>, transform_indices = @transform_5, window_bounds = array<i64: 1, 128>}, {transform_indices = @transform_6, window_bounds = array<i64: 8, 128>}]} {
    %c0 = arith.constant 0 : index
    %c0_0 = arith.constant 0 : index
    %0 = vector.load %arg1[%c0, %c0_0] : memref<8x6xi32, #tpu.memory_space<vmem>>, vector<8x6xi32>
    %c0_1 = arith.constant 0 : index
    %c0_2 = arith.constant 0 : index
    %1 = vector.load %arg2[%c0_1, %c0_2] : memref<56x128xf32, #tpu.memory_space<vmem>>, vector<56x128xf32>
    %2 = tpu.iota {dimensions = array<i32: 1>} : vector<8x56xi32>
    %3 = vector.extract_strided_slice %0 {offsets = [0, 0], sizes = [8, 1], strides = [1, 1]} : vector<8x6xi32> to vector<8x1xi32>
    %4 = vector.broadcast %3 : vector<8x1xi32> to vector<8x56xi32>
    %5 = arith.cmpi eq, %2, %4 : vector<8x56xi32>
    %6 = arith.extui %5 : vector<8x56xi1> to vector<8x56xi32>
    %7 = arith.sitofp %6 : vector<8x56xi32> to vector<8x56xf32>
    %cst = arith.constant dense<0.000000e+00> : vector<8x128xf32>
    %8 = tpu.matmul %7, %1, %cst {dimension_numbers = #tpu.dot_dimension_numbers<[1], [0], [0], [1], [0, 0, 1, 1], [], []>} : vector<8x56xf32>, vector<56x128xf32>, vector<8x128xf32> -> vector<8x128xf32>
    %9 = vector.extract_strided_slice %0 {offsets = [0, 1], sizes = [8, 1], strides = [1, 1]} : vector<8x6xi32> to vector<8x1xi32>
    %10 = vector.broadcast %9 : vector<8x1xi32> to vector<8x56xi32>
    %11 = arith.cmpi eq, %2, %10 : vector<8x56xi32>
    %12 = arith.extui %11 : vector<8x56xi1> to vector<8x56xi32>
    %13 = arith.sitofp %12 : vector<8x56xi32> to vector<8x56xf32>
    %cst_3 = arith.constant dense<0.000000e+00> : vector<8x128xf32>
    %14 = tpu.matmul %13, %1, %cst_3 {dimension_numbers = #tpu.dot_dimension_numbers<[1], [0], [0], [1], [0, 0, 1, 1], [], []>} : vector<8x56xf32>, vector<56x128xf32>, vector<8x128xf32> -> vector<8x128xf32>
    %15 = vector.extract_strided_slice %0 {offsets = [0, 2], sizes = [8, 1], strides = [1, 1]} : vector<8x6xi32> to vector<8x1xi32>
    %16 = vector.broadcast %15 : vector<8x1xi32> to vector<8x56xi32>
    %17 = arith.cmpi eq, %2, %16 : vector<8x56xi32>
    %18 = arith.extui %17 : vector<8x56xi1> to vector<8x56xi32>
    %19 = arith.sitofp %18 : vector<8x56xi32> to vector<8x56xf32>
    %cst_4 = arith.constant dense<0.000000e+00> : vector<8x128xf32>
    %20 = tpu.matmul %19, %1, %cst_4 {dimension_numbers = #tpu.dot_dimension_numbers<[1], [0], [0], [1], [0, 0, 1, 1], [], []>} : vector<8x56xf32>, vector<56x128xf32>, vector<8x128xf32> -> vector<8x128xf32>
    %21 = vector.extract_strided_slice %0 {offsets = [0, 3], sizes = [8, 1], strides = [1, 1]} : vector<8x6xi32> to vector<8x1xi32>
    %22 = vector.broadcast %21 : vector<8x1xi32> to vector<8x56xi32>
    %23 = arith.cmpi eq, %2, %22 : vector<8x56xi32>
    %24 = arith.extui %23 : vector<8x56xi1> to vector<8x56xi32>
    %25 = arith.sitofp %24 : vector<8x56xi32> to vector<8x56xf32>
    %cst_5 = arith.constant dense<0.000000e+00> : vector<8x128xf32>
    %26 = tpu.matmul %25, %1, %cst_5 {dimension_numbers = #tpu.dot_dimension_numbers<[1], [0], [0], [1], [0, 0, 1, 1], [], []>} : vector<8x56xf32>, vector<56x128xf32>, vector<8x128xf32> -> vector<8x128xf32>
    %27 = vector.extract_strided_slice %0 {offsets = [0, 4], sizes = [8, 1], strides = [1, 1]} : vector<8x6xi32> to vector<8x1xi32>
    %28 = vector.broadcast %27 : vector<8x1xi32> to vector<8x56xi32>
    %29 = arith.cmpi eq, %2, %28 : vector<8x56xi32>
    %30 = arith.extui %29 : vector<8x56xi1> to vector<8x56xi32>
    %31 = arith.sitofp %30 : vector<8x56xi32> to vector<8x56xf32>
    %cst_6 = arith.constant dense<0.000000e+00> : vector<8x128xf32>
    %32 = tpu.matmul %31, %1, %cst_6 {dimension_numbers = #tpu.dot_dimension_numbers<[1], [0], [0], [1], [0, 0, 1, 1], [], []>} : vector<8x56xf32>, vector<56x128xf32>, vector<8x128xf32> -> vector<8x128xf32>
    %33 = vector.extract_strided_slice %0 {offsets = [0, 5], sizes = [8, 1], strides = [1, 1]} : vector<8x6xi32> to vector<8x1xi32>
    %34 = vector.broadcast %33 : vector<8x1xi32> to vector<8x56xi32>
    %35 = arith.cmpi eq, %2, %34 : vector<8x56xi32>
    %36 = arith.extui %35 : vector<8x56xi1> to vector<8x56xi32>
    %37 = arith.sitofp %36 : vector<8x56xi32> to vector<8x56xf32>
    %cst_7 = arith.constant dense<0.000000e+00> : vector<8x128xf32>
    %38 = tpu.matmul %37, %1, %cst_7 {dimension_numbers = #tpu.dot_dimension_numbers<[1], [0], [0], [1], [0, 0, 1, 1], [], []>} : vector<8x56xf32>, vector<56x128xf32>, vector<8x128xf32> -> vector<8x128xf32>
    %39 = tpu.concatenate %8, %14, %20, %26, %32, %38 in 1 : vector<8x128xf32>, vector<8x128xf32>, vector<8x128xf32>, vector<8x128xf32>, vector<8x128xf32>, vector<8x128xf32> -> vector<8x768xf32>
    %40 = arith.truncf %39 : vector<8x768xf32> to vector<8x768xbf16>
    %c0_8 = arith.constant 0 : index
    %c0_9 = arith.constant 0 : index
    %41 = vector.load %arg3[%c0_8, %c0_9] : memref<768x128xbf16, #tpu.memory_space<vmem>>, vector<768x128xbf16>
    %cst_10 = arith.constant dense<0.000000e+00> : vector<8x128xf32>
    %42 = tpu.matmul %40, %41, %cst_10 {dimension_numbers = #tpu.dot_dimension_numbers<[1], [0], [0], [1], [0, 0, 1, 1], [], []>} : vector<8x768xbf16>, vector<768x128xbf16>, vector<8x128xf32> -> vector<8x128xf32>
    %c0_11 = arith.constant 0 : index
    %c0_12 = arith.constant 0 : index
    %43 = vector.load %arg4[%c0_11, %c0_12] : memref<1x128xf32, #tpu.memory_space<vmem>>, vector<1x128xf32>
    %44 = vector.broadcast %43 : vector<1x128xf32> to vector<8x128xf32>
    %45 = arith.addf %42, %44 : vector<8x128xf32>
    %cst_13 = arith.constant 0.000000e+00 : f32
    %46 = vector.broadcast %cst_13 : f32 to vector<8x128xf32>
    %47 = arith.maximumf %45, %46 : vector<8x128xf32>
    %48 = arith.truncf %47 : vector<8x128xf32> to vector<8x128xbf16>
    %c0_14 = arith.constant 0 : index
    %c0_15 = arith.constant 0 : index
    %49 = vector.load %arg5[%c0_14, %c0_15] : memref<128x128xbf16, #tpu.memory_space<vmem>>, vector<128x128xbf16>
    %cst_16 = arith.constant dense<0.000000e+00> : vector<8x128xf32>
    %50 = tpu.matmul %48, %49, %cst_16 {dimension_numbers = #tpu.dot_dimension_numbers<[1], [0], [0], [1], [0, 0, 1, 1], [], []>} : vector<8x128xbf16>, vector<128x128xbf16>, vector<8x128xf32> -> vector<8x128xf32>
    %c0_17 = arith.constant 0 : index
    %c0_18 = arith.constant 0 : index
    %51 = vector.load %arg6[%c0_17, %c0_18] : memref<1x128xf32, #tpu.memory_space<vmem>>, vector<1x128xf32>
    %52 = vector.broadcast %51 : vector<1x128xf32> to vector<8x128xf32>
    %53 = arith.addf %50, %52 : vector<8x128xf32>
    %c0_19 = arith.constant 0 : index
    %c0_20 = arith.constant 0 : index
    %54 = vector.load %arg7[%c0_19, %c0_20] : memref<8x128xf32, #tpu.memory_space<vmem>>, vector<8x128xf32>
    tpu.vector_store %arg7[%c0_19, %c0_20], %53 {strides = array<i32>} : memref<8x128xf32, #tpu.memory_space<vmem>>, vector<8x128xf32>,
    return
  }
  func.func @transform_0(%arg0: i32) -> (i32, i32) {
    %c0_i32 = arith.constant 0 : i32
    %c0_i32_0 = arith.constant 0 : i32
    return %arg0, %c0_i32 : i32, i32
  }
  func.func @transform_1(%arg0: i32) -> (i32, i32) {
    %c0_i32 = arith.constant 0 : i32
    %c0_i32_0 = arith.constant 0 : i32
    %c0_i32_1 = arith.constant 0 : i32
    return %c0_i32, %c0_i32_0 : i32, i32
  }
  func.func @transform_2(%arg0: i32) -> (i32, i32) {
    %c0_i32 = arith.constant 0 : i32
    %c0_i32_0 = arith.constant 0 : i32
    %c0_i32_1 = arith.constant 0 : i32
    return %c0_i32, %c0_i32_0 : i32, i32
  }
  func.func @transform_3(%arg0: i32) -> (i32, i32) {
    %c0_i32 = arith.constant 0 : i32
    %c0_i32_0 = arith.constant 0 : i32
    %c0_i32_1 = arith.constant 0 : i32
    return %c0_i32, %c0_i32_0 : i32, i32
  }
  func.func @transform_4(%arg0: i32) -> (i32, i32) {
    %c0_i32 = arith.constant 0 : i32
    %c0_i32_0 = arith.constant 0 : i32
    %c0_i32_1 = arith.constant 0 : i32
    return %c0_i32, %c0_i32_0 : i32, i32
  }
  func.func @transform_5(%arg0: i32) -> (i32, i32) {
    %c0_i32 = arith.constant 0 : i32
    %c0_i32_0 = arith.constant 0 : i32
    %c0_i32_1 = arith.constant 0 : i32
    return %c0_i32, %c0_i32_0 : i32, i32
  }
  func.func @transform_6(%arg0: i32) -> (i32, i32) {
    %c0_i32 = arith.constant 0 : i32
    %c0_i32_0 = arith.constant 0 : i32
    return %arg0, %c0_i32 : i32, i32
  }
}

</mosaic_0001>

<bundles_post_ra>
// kernel: dependency_model_forward.1
= control target key start
LH: loop header
LB: loop body
LE: loop exit
PB: predicated region body
PF: predicated region fallthrough
CT: control target
= control target key end

     0   :  { %v1621_v2 = vmov 1   ;;  %v1622_v3 = vmov 3   ;;  %v1623_v8 = vmov 0.0|0.0   ;;  %v1624_v12 = vmov 0   ;;  %s1966_s0 = inlined_call_operand.vmem [shape: s32[8,6], index: 0, kind: input, shape index: {}]   ;;  %s1967_s1 = inlined_call_operand.vmem [shape: f32[56,128], index: 1, kind: input, shape index: {}]   ;;  %s1968_s2 = inlined_call_operand.vmem [shape: bf16[768,128], index: 2, kind: input, shape index: {}]   ;;  %s1969_s3 = inlined_call_operand.vmem [shape: f32[1,128], index: 3, kind: input, shape index: {}]   ;;  %s1970_s4 = inlined_call_operand.vmem [shape: bf16[128,128], index: 4, kind: input, shape index: {}]   ;;  %s1971_s5 = inlined_call_operand.vmem [shape: f32[1,128], index: 5, kind: input, shape index: {}]   ;;  %s1972_s6 = inlined_call_operand.hbm [shape: f32[8,128], index: 6, kind: output, shape index: {}]  }
   0x1   :  { %v25_v0 = vld [vmem:[%s1966_s0] sm:$0xff]  ;;  %1534 = vset.pattern.permute.xlu0 %v1621_v2  ;;  %1536 = vset.pattern.permute.xlu1 %v1622_v3  ;;  %v27_v4 = vld [vmem:[%s1967_s1 + $0x8] sm:$0xff]  ;;  %v28_v5 = vld [vmem:[%s1967_s1 + $0x10] sm:$0xff]  ;;  %v1625_v13 = vmov 2   ;;  %vm1626_vm0 = vmmov 0   ;;  %v1627_v15 = vmov 0.0  }
   0x2   :  { %v26_v1 = vld [vmem:[%s1967_s1] sm:$0xff]  ;;  %v29_v6 = vld [vmem:[%s1967_s1 + $0x18] sm:$0xff]  ;;  %116 = vperm.xlu0 %1534, %v25_v0   ;;  %274 = vperm.xlu1 %1536, %v25_v0   ;;  %v31_v11 = vld [vmem:[%s1967_s1 + $0x28] sm:$0xff]  ;;  %v1628_v16 = vmov 5   ;;  %v1629_v17 = vmov 4  }
   0x3   :  { %v1681_v7 = vpack.c.bf16 %v27_v4, %v26_v1  ;;  %1479 = vmatprep.subr.bf16.mxu1 %v1623_v8  ;;  %1470 = vmatprep.subr.bf16.mxu0 %v1623_v8  ;;  %v1687_v9 = vpack.c.bf16 %v29_v6, %v28_v5  ;;  %v30_v10 = vld [vmem:[%s1967_s1 + $0x20] sm:$0xff]  ;;  %v1710_v18 = vld [vmem:[%s1967_s1 + $0x30] sm:$0xff] }
   0x4   :  { %v1700_v14 = vpack.c.bf16 %v31_v11, %v30_v10  ;;  %1379 = vmatprep.mubr.msk.f32.mxu1 %vm1626_vm0, %v1627_v15  ;;  %1362 = vmatprep.mubr.msk.f32.mxu0 %vm1626_vm0, %v1627_v15 }
   0x5   :  { %1481 = vmatpush3.bf16.msra.mxu1 %v1681_v7  ;;  %1472 = vmatpush3.bf16.msra.mxu0 %v1681_v7 }
   0x6   :  { %1482 = vmatprep.subr.bf16.mxu1 %v1623_v8  ;;  %1473 = vmatprep.subr.bf16.mxu0 %v1623_v8 }
   0x7   :  { %1535 = vset.pattern.permute.xlu0 %v1624_v12  ;;  %1537 = vset.pattern.permute.xlu1 %v1625_v13 }
   0x8   :  { %36 = vperm.xlu0 %1535, %v25_v0   ;;  %195 = vperm.xlu1 %1537, %v25_v0  }
   0x9   :  { %1484 = vmatpush3.bf16.msra.mxu1 %v1687_v9  ;;  %1475 = vmatpush3.bf16.msra.mxu0 %v1687_v9 }
   0xa   :  { %1485 = vmatprep.subr.bf16.mxu1 %v1623_v8  ;;  %1476 = vmatprep.subr.bf16.mxu0 %v1623_v8 }
   0xc   :  { %1538 = vset.pattern.permute.xlu1 %v1628_v16  ;;  %1539 = vset.pattern.permute.xlu0 %v1629_v17 }
   0xd   :  { %432 = vperm.xlu1 %1538, %v25_v0   ;;  %353 = vperm.xlu0 %1539, %v25_v0  }
   0xe   :  { %1487 = vmatpush3.bf16.msra.mxu1 %v1700_v14  ;;  %1478 = vmatpush3.bf16.msra.mxu0 %v1700_v14 }
   0xf   :  { %1377 = vmatprep.subr.mxu1 %v1627_v15  ;;  %1360 = vmatprep.subr.mxu0 %v1627_v15 }
  0x11   :  { %1540 = vset.pattern.permute.xlu0 %v1628_v16 }
  0x12   :  { %1378 = vmatpush3.msra.mxu1 %v1710_v18  ;;  %1361 = vmatpush3.msra.mxu0 %v1710_v18 }
  0x13   :  { %1497 = vmatprep.subr.bf16.mxu1 %v1623_v8  ;;  %1488 = vmatprep.subr.bf16.mxu0 %v1623_v8 }
  0x14   :  { %11 = vsyncpa [#allocation3], 0  ;;  %v33_v19 = vlaneseq  ;;  %vm41_vm1 = vcmask 457728   ;;  %v1549_v32 = vld [vmem:[%s1968_s2 + $0xc0] sm:$0xff]   ;;  %v1553_v34 = vld [vmem:[%s1968_s2 + $0xc8] sm:$0xff]  }
  0x15   :  { %v1550_v33 = vld [vmem:[%s1968_s2 + $0x80] sm:$0xff]   ;;  %v1543_v38 = vld [vmem:[%s1968_s2 + $0x48] sm:$0xff]   ;;  %v1557_v40 = vld [vmem:[%s1968_s2 + $0xd0] sm:$0xff]  }
  0x16   :  { %v34_v20 = vand.u32 127, %v33_v19  ;;  %v1541_v35 = vld [vmem:[%s1968_s2 + $0x40] sm:$0xff]   ;;  %v1554_v39 = vld [vmem:[%s1968_s2 + $0x88] sm:$0xff]   ;;  %v1545_v42 = vld [vmem:[%s1968_s2 + $0x50] sm:$0xff]  }
  0x17   :  { %v1542_v37 = vld [vmem:[%s1968_s2] sm:$0xff]   ;;  %v1544_v41 = vld [vmem:[%s1968_s2 + $0x8] sm:$0xff]   ;;  %v1558_v43 = vld [vmem:[%s1968_s2 + $0x90] sm:$0xff]  }
  0x18   :  { %v1546_v44 = vld [vmem:[%s1968_s2 + $0x10] sm:$0xff]   ;;  %v1547_v45 = vld [vmem:[%s1968_s2 + $0x58] sm:$0xff]   ;;  %v1551_v47 = vld [vmem:[%s1968_s2 + $0x60] sm:$0xff]  }
  0x19   :  { %v1548_v46 = vld [vmem:[%s1968_s2 + $0x18] sm:$0xff]   ;;  %v1552_v48 = vld [vmem:[%s1968_s2 + $0x20] sm:$0xff]   ;;  %v1555_v49 = vld [vmem:[%s1968_s2 + $0x68] sm:$0xff]  }
  0x1a   :  { %v1556_v50 = vld [vmem:[%s1968_s2 + $0x28] sm:$0xff]   ;;  %v1559_v51 = vld [vmem:[%s1968_s2 + $0x70] sm:$0xff]   ;;  %v1561_v53 = vld [vmem:[%s1968_s2 + $0xd8] sm:$0xff]  }
  0x1b   :  { %v1560_v52 = vld [vmem:[%s1968_s2 + $0x30] sm:$0xff]   ;;  %v1562_v54 = vld [vmem:[%s1968_s2 + $0x98] sm:$0xff]   ;;  %v1565_v57 = vld [vmem:[%s1968_s2 + $0xe0] sm:$0xff]  }
  0x1c   :  { %v1563_v55 = vld [vmem:[%s1968_s2 + $0x78] sm:$0xff]   ;;  %v1566_v58 = vld [vmem:[%s1968_s2 + $0xa0] sm:$0xff]   ;;  %v1569_v60 = vld [vmem:[%s1968_s2 + $0xe8] sm:$0xff]  }
  0x1d   :  { %v1564_v56 = vld [vmem:[%s1968_s2 + $0x38] sm:$0xff]   ;;  %v1567_v59 = vld [vmem:[%s1968_s2 + $0x140] sm:$0xff]   ;;  %v1570_v61 = vld [vmem:[%s1968_s2 + $0xa8] sm:$0xff]  }
  0x1e   :  { %v1573_v62 = vld [vmem:[%s1968_s2 + $0xf0] sm:$0xff]   ;;  %v1577_v0 = vld [vmem:[%s1968_s2 + $0xf8] sm:$0xff]   ;;  %v1568_v6 = vld [vmem:[%s1968_s2 + $0x100] sm:$0xff]  }
  0x1f   :  { %v1574_v63 = vld [vmem:[%s1968_s2 + $0xb0] sm:$0xff]   ;;  %v1578_v1 = vld [vmem:[%s1968_s2 + $0xb8] sm:$0xff]   ;;  %v1572_v10 = vld [vmem:[%s1968_s2 + $0x108] sm:$0xff]  }
  0x20   :  { %v1575_v11 = vld [vmem:[%s1968_s2 + $0x150] sm:$0xff]   ;;  %v1581_v19 = vld [vmem:[%s1968_s2 + $0x160] sm:$0xff]  }
  0x21   :  { %v1576_v12 = vld [vmem:[%s1968_s2 + $0x110] sm:$0xff]  }
  0x81   :  { %v117_v21 = vpop.permute.xlu0 %116  ;;  %v275_v25 = vpop.permute.xlu1 %274 }
  0x82   :  { %vm118_vm2 = vcmp.eq.s32.totalorder %v34_v20, %v117_v21  ;;  %vm276_vm4 = vcmp.eq.s32.totalorder %v34_v20, %v275_v25  ;;  %v1584_v25 = vld [vmem:[%s1968_s2 + $0x128] sm:$0xff]  }
  0x83   :  { %v1157_v22 = vsel %vm118_vm2, 1.0, %v1627_v15  ;;  %v1161_v27 = vsel %vm276_vm4, 1.0, %v1627_v15 }
  0x84   :  { %1380 = vmatmul.mubr.msk.f32.vlgmr.msra.gmra.mrb[0].mxu1 %vm41_vm1, %v1157_v22 }
  0x85   :  { %1499 = vmatpush3.bf16.msra.mxu1 %v1681_v7  ;;  %1413 = vmatprep.mubr.msk.f32.mxu1 %vm1626_vm0, %v1627_v15 }
  0x86   :  { %1500 = vmatprep.subr.bf16.mxu1 %v1623_v8 }
  0x87   :  { %v37_v23 = vpop.permute.xlu0 %36  ;;  %v196_v26 = vpop.permute.xlu1 %195 }
  0x88   :  { %vm38_vm3 = vcmp.eq.s32.totalorder %v34_v20, %v37_v23  ;;  %vm197_vm5 = vcmp.eq.s32.totalorder %v34_v20, %v196_v26  ;;  %v1582_v23 = vld [vmem:[%s1968_s2 + $0x120] sm:$0xff]   ;;  %v1585_v26 = vld [vmem:[%s1968_s2 + $0x170] sm:$0xff]  }
  0x89   :  { %v1155_v24 = vsel %vm38_vm3, 1.0, %v1627_v15  ;;  %1502 = vmatpush3.bf16.msra.mxu1 %v1687_v9  ;;  %v1159_v28 = vsel %vm197_vm5, 1.0, %v1627_v15 }
  0x8a   :  { %1363 = vmatmul.mubr.msk.f32.vlgmr.msra.gmra.mrb[0].mxu0 %vm41_vm1, %v1155_v24  ;;  %1503 = vmatprep.subr.bf16.mxu1 %v1623_v8  ;;  %v1583_v24 = vld [vmem:[%s1968_s2 + $0x168] sm:$0xff]  }
  0x8b   :  { %1490 = vmatpush3.bf16.msra.mxu0 %v1681_v7  ;;  %1396 = vmatprep.mubr.msk.f32.mxu0 %vm1626_vm0, %v1627_v15 }
  0x8c   :  { %1491 = vmatprep.subr.bf16.mxu0 %v1623_v8  ;;  %v433_v29 = vpop.permute.xlu1 %432  ;;  %v354_v30 = vpop.permute.xlu0 %353 }
  0x8d   :  { %1505 = vmatpush3.bf16.msra.mxu1 %v1700_v14  ;;  %vm434_vm6 = vcmp.eq.s32.totalorder %v34_v20, %v433_v29  ;;  %vm355_vm7 = vcmp.eq.s32.totalorder %v34_v20, %v354_v30 }
  0x8e   :  { %1411 = vmatprep.subr.mxu1 %v1627_v15  ;;  %v1165_v31 = vsel %vm434_vm6, 1.0, %v1627_v15  ;;  %v1163_v36 = vsel %vm355_vm7, 1.0, %v1627_v15 }
  0x8f   :  { %1493 = vmatpush3.bf16.msra.mxu0 %v1687_v9 }
  0x90   :  { %1494 = vmatprep.subr.bf16.mxu0 %v1623_v8 }
  0x91   :  { %1412 = vmatpush3.msra.mxu1 %v1710_v18 }
  0x92   :  { %1414 = vmatmul.mubr.msk.f32.vlgmr.msra.gmra.mrb[2].mxu1 %vm41_vm1, %v1161_v27  ;;  %1515 = vmatprep.subr.bf16.mxu1 %v1623_v8  ;;  %v1586_v27 = vld [vmem:[%s1968_s2 + $0x130] sm:$0xff]  }
  0x93   :  { %1496 = vmatpush3.bf16.msra.mxu0 %v1700_v14  ;;  %1517 = vmatpush3.bf16.msra.mxu1 %v1681_v7 }
  0x94   :  { %1394 = vmatprep.subr.mxu0 %v1627_v15  ;;  %1447 = vmatprep.mubr.msk.f32.mxu1 %vm1626_vm0, %v1627_v15 }
  0x95   :  { %1518 = vmatprep.subr.bf16.mxu1 %v1623_v8 }
  0x97   :  { %1395 = vmatpush3.msra.mxu0 %v1710_v18  ;;  %1520 = vmatpush3.bf16.msra.mxu1 %v1687_v9 }
  0x98   :  { %1397 = vmatmul.mubr.msk.f32.vlgmr.msra.gmra.mrb[2].mxu0 %vm41_vm1, %v1159_v28  ;;  %1506 = vmatprep.subr.bf16.mxu0 %v1623_v8 }
  0x99   :  { %1508 = vmatpush3.bf16.msra.mxu0 %v1681_v7  ;;  %1521 = vmatprep.subr.bf16.mxu1 %v1623_v8 }
  0x9a   :  { %1509 = vmatprep.subr.bf16.mxu0 %v1623_v8  ;;  %1430 = vmatprep.mubr.msk.f32.mxu0 %vm1626_vm0, %v1627_v15 }
  0x9b   :  { %1523 = vmatpush3.bf16.msra.mxu1 %v1700_v14 }
  0x9c   :  { %1445 = vmatprep.subr.mxu1 %v1627_v15 }
  0x9d   :  { %1511 = vmatpush3.bf16.msra.mxu0 %v1687_v9  ;;  %v1571_v9 = vld [vmem:[%s1968_s2 + $0x148] sm:$0xff]  }
  0x9e   :  { %1512 = vmatprep.subr.bf16.mxu0 %v1623_v8 }
  0x9f   :  { %1446 = vmatpush3.msra.mxu1 %v1710_v18 }
  0xa0   :  { %1448 = vmatmul.mubr.msk.f32.vlgmr.msra.gmra.mrb[4].mxu1 %vm41_vm1, %v1165_v31  ;;  %1295 = vmatprep.subr.bf16.mxu1 %v1549_v32  ;;  %v1587_v31 = vld [vmem:[%s1968_s2 + $0x178] sm:$0xff]  }
  0xa1   :  { %1514 = vmatpush3.bf16.msra.mxu0 %v1700_v14  ;;  %1296 = vmatpush3.bf16.msra.mxu1 %v1550_v33  ;;  %v1579_v14 = vld [vmem:[%s1968_s2 + $0x158] sm:$0xff]  }
  0xa2   :  { %1428 = vmatprep.subr.mxu0 %v1627_v15  ;;  %1297 = vmatprep.subr.bf16.mxu1 %v1553_v34  ;;  %v1588_v33 = vld [vmem:[%s1968_s2 + $0x138] sm:$0xff]  }
  0xa5   :  { %1429 = vmatpush3.msra.mxu0 %v1710_v18  ;;  %1298 = vmatpush3.bf16.msra.mxu1 %v1554_v39  ;;  %v1580_v18 = vld [vmem:[%s1968_s2 + $0x118] sm:$0xff]  }
  0xa6   :  { %1431 = vmatmul.mubr.msk.f32.vlgmr.msra.gmra.mrb[4].mxu0 %vm41_vm1, %v1163_v36  ;;  %1273 = vmatprep.subr.bf16.mxu0 %v1541_v35  ;;  %v1589_v36 = vld [vmem:[%s1970_s4] sm:$0xff]   ;;  %v1592_v39 = vld [vmem:[%s1970_s4 + $0x18] sm:$0xff]  }
  0xa7   :  { %1274 = vmatpush3.bf16.msra.mxu0 %v1542_v37  ;;  %1299 = vmatprep.subr.bf16.mxu1 %v1557_v40  ;;  %v1590_v37 = vld [vmem:[%s1970_s4 + $0x8] sm:$0xff]   ;;  %v1593_v40 = vld [vmem:[%s1970_s4 + $0x20] sm:$0xff]  }
  0xa8   :  { %1275 = vmatprep.subr.bf16.mxu0 %v1543_v38  ;;  %v1591_v38 = vld [vmem:[%s1970_s4 + $0x10] sm:$0xff]  }
  0xa9   :  { %1300 = vmatpush3.bf16.msra.mxu1 %v1558_v43  ;;  %v1596_v43 = vld [vmem:[%s1970_s4 + $0x38] sm:$0xff]  }
  0xaa   :  { %1301 = vmatprep.subr.bf16.mxu1 %v1561_v53 }
  0xab   :  { %1276 = vmatpush3.bf16.msra.mxu0 %v1544_v41  ;;  %v1594_v41 = vld [vmem:[%s1970_s4 + $0x28] sm:$0xff]  }
  0xac   :  { %1277 = vmatprep.subr.bf16.mxu0 %v1545_v42  ;;  %v1595_v42 = vld [vmem:[%s1970_s4 + $0x30] sm:$0xff]  }
  0xad   :  { %1302 = vmatpush3.bf16.msra.mxu1 %v1562_v54 }
  0xae   :  { %1303 = vmatprep.subr.bf16.mxu1 %v1565_v57 }
  0xaf   :  { %1278 = vmatpush3.bf16.msra.mxu0 %v1546_v44 }
  0xb0   :  { %1279 = vmatprep.subr.bf16.mxu0 %v1547_v45 }
  0xb1   :  { %1304 = vmatpush3.bf16.msra.mxu1 %v1566_v58 }
  0xb2   :  { %1305 = vmatprep.subr.bf16.mxu1 %v1569_v60 }
  0xb3   :  { %1280 = vmatpush3.bf16.msra.mxu0 %v1548_v46 }
  0xb4   :  { %1281 = vmatprep.subr.bf16.mxu0 %v1551_v47 }
  0xb5   :  { %1306 = vmatpush3.bf16.msra.mxu1 %v1570_v61 }
  0xb6   :  { %1307 = vmatprep.subr.bf16.mxu1 %v1573_v62 }
  0xb7   :  { %1282 = vmatpush3.bf16.msra.mxu0 %v1552_v48 }
  0xb8   :  { %1283 = vmatprep.subr.bf16.mxu0 %v1555_v49  ;;  %v1167_v49 = vld [vmem:[%s1969_s3] ss:$0 sm:$0xff]  ;;  %s1630_s3 = smov [#allocation2]  }
  0xb9   :  { %1308 = vmatpush3.bf16.msra.mxu1 %v1574_v63  ;;  %s1147_s21 = sshll.u32 %s1630_s3, 4  ;;  %s1148_s21 = int_to_ptr.vmem [resolvable:$true] %s1147_s21 }
  0xba   :  { %1309 = vmatprep.subr.bf16.mxu1 %v1577_v0  ;;  %v1216_v0 = vld [vmem:[%s1971_s5] ss:$0 sm:$0xff]  ;;  %s1597_s22 = scalar_lea.vmem %s1148_s21, 128  ;;  %p1602_p1 = scmp.lt.s32.totalorder %s1148_s21, %s1148_s21 }
  0xbb   :  { %1284 = vmatpush3.bf16.msra.mxu0 %v1556_v50  ;;  %p1598_p0 = scmp.ne.s32.totalorder %s1148_s21, %s1597_s22  ;;  %p1603_p2 = scmp.lt.s32.totalorder %s1597_s22, %s1597_s22 }
  0xbc   :  { %1285 = vmatprep.subr.bf16.mxu0 %v1559_v51 }
  0xbd   :  { %1310 = vmatpush3.bf16.msra.mxu1 %v1578_v1  ;;  %p1604_p3 = por %p1603_p2, %p1602_p1 }
  0xbe   :  { %1450 = vmatprep.subr.bf16.mxu1 %v1627_v15 }
  0xbf   :  { %1286 = vmatpush3.bf16.msra.mxu0 %v1560_v52  ;;  %p1605_p4 = pnand %p1604_p3, %p1598_p0 }
  0xc0   :  { %1287 = vmatprep.subr.bf16.mxu0 %v1563_v55 }
  0xc3   :  { %1288 = vmatpush3.bf16.msra.mxu0 %v1564_v56 }
  0xc4   :  { %1317 = vmatprep.subr.bf16.mxu0 %v1567_v59 }
 0x157   :  { %v190_v2 = vpop.f32.mrb[0].mxu1 }
 0x158   :  { %v511_v3 = vpack.c.bf16 %v190_v2, %v190_v2  ;;  %v1381_v4 = vpop.f32.mrb[1].mxu1 }
 0x15a   :  { %939 = vmatprep.mubr.bf16.mxu0 %v511_v3 }
 0x15d   :  { %v111_v5 = vpop.f32.mrb[0].mxu0 }
 0x15e   :  { %v510_v7 = vpack.c.bf16 %v111_v5, %v111_v5  ;;  %v1364_v8 = vpop.f32.mrb[1].mxu0 }
 0x160   :  { %940 = vmatmul.mubr.bf16.vlgmr.msra.gmra.mrb[8].mxu0 %v510_v7 }
 0x161   :  { %1318 = vmatpush3.bf16.msra.mxu0 %v1568_v6 }
 0x162   :  { %1319 = vmatprep.subr.bf16.mxu0 %v1571_v9 }
 0x165   :  { %1320 = vmatpush3.bf16.msra.mxu0 %v1572_v10  ;;  %v348_v13 = vpop.f32.mrb[2].mxu1 }
 0x166   :  { %1321 = vmatprep.subr.bf16.mxu0 %v1575_v11  ;;  %v513_v16 = vpack.c.bf16 %v348_v13, %v348_v13  ;;  %v1415_v17 = vpop.f32.mrb[3].mxu1 }
 0x168   :  { %979 = vmatprep.mubr.bf16.mxu1 %v513_v16 }
 0x169   :  { %1322 = vmatpush3.bf16.msra.mxu0 %v1576_v12 }
 0x16a   :  { %1323 = vmatprep.subr.bf16.mxu0 %v1579_v14 }
 0x16b   :  { %v269_v20 = vpop.f32.mrb[2].mxu0 }
 0x16c   :  { %v512_v21 = vpack.c.bf16 %v269_v20, %v269_v20  ;;  %v1398_v22 = vpop.f32.mrb[3].mxu0 }
 0x16d   :  { %1324 = vmatpush3.bf16.msra.mxu0 %v1580_v18 }
 0x16e   :  { %980 = vmatmul.mubr.bf16.vlgmr.msra.gmra.mrb[8].mxu1 %v512_v21  ;;  %1325 = vmatprep.subr.bf16.mxu0 %v1581_v19 }
 0x16f   :  { %1466 = vmatprep.mubr.msk.bf16.mxu1 %vm1626_vm0, %v1627_v15  ;;  %1451 = vmatpush3.bf16.msra.mxu1 %v1589_v36 }
 0x170   :  { %1452 = vmatprep.subr.bf16.mxu1 %v1627_v15 }
 0x171   :  { %1326 = vmatpush3.bf16.msra.mxu0 %v1582_v23 }
 0x172   :  { %1327 = vmatprep.subr.bf16.mxu0 %v1583_v24 }
 0x173   :  { %v506_v28 = vpop.f32.mrb[4].mxu1  ;;  %1453 = vmatpush3.bf16.msra.mxu1 %v1590_v37 }
 0x174   :  { %v515_v29 = vpack.c.bf16 %v506_v28, %v506_v28  ;;  %v1449_v30 = vpop.f32.mrb[5].mxu1  ;;  %1454 = vmatprep.subr.bf16.mxu1 %v1627_v15 }
 0x175   :  { %1328 = vmatpush3.bf16.msra.mxu0 %v1584_v25 }
 0x176   :  { %1329 = vmatprep.subr.bf16.mxu0 %v1585_v26  ;;  %1019 = vmatprep.mubr.bf16.mxu0 %v515_v29 }
 0x177   :  { %1455 = vmatpush3.bf16.msra.mxu1 %v1591_v38 }
 0x178   :  { %1456 = vmatprep.subr.bf16.mxu1 %v1627_v15 }
 0x179   :  { %1330 = vmatpush3.bf16.msra.mxu0 %v1586_v27  ;;  %v427_v32 = vpop.f32.mrb[4].mxu0 }
 0x17a   :  { %1331 = vmatprep.subr.bf16.mxu0 %v1587_v31  ;;  %v1432_v34 = vpop.f32.mrb[5].mxu0  ;;  %v514_v35 = vpack.c.bf16 %v427_v32, %v427_v32 }
 0x17b   :  { %1457 = vmatpush3.bf16.msra.mxu1 %v1592_v39 }
 0x17c   :  { %1458 = vmatprep.subr.bf16.mxu1 %v1627_v15 }
 0x17d   :  { %1332 = vmatpush3.bf16.msra.mxu0 %v1588_v33 }
 0x17f   :  { %1459 = vmatpush3.bf16.msra.mxu1 %v1593_v40 }
 0x180   :  { %1020 = vmatmul.mubr.bf16.vlgmr.msra.gmra.mrb[12].mxu0 %v514_v35  ;;  %1460 = vmatprep.subr.bf16.mxu1 %v1627_v15 }
 0x183   :  { %1461 = vmatpush3.bf16.msra.mxu1 %v1594_v41 }
 0x184   :  { %1462 = vmatprep.subr.bf16.mxu1 %v1627_v15 }
 0x187   :  { %1463 = vmatpush3.bf16.msra.mxu1 %v1595_v42 }
 0x188   :  { %1464 = vmatprep.subr.bf16.mxu1 %v1627_v15 }
 0x18b   :  { %1465 = vmatpush3.bf16.msra.mxu1 %v1596_v43 }
 0x233   :  { %v1289_v44 = vpop.f32.mrb[8].mxu0 }
 0x234   :  { %v1290_v45 = vpop.f32.mrb[9].mxu0 }
 0x235   :  { %v1291_v46 = vadd.f32 %v1290_v45, %v1289_v44  ;;  %v1292_v47 = vpop.f32.mrb[10].mxu0 }
 0x236   :  { %v1293_v48 = vpop.f32.mrb[11].mxu0 }
 0x237   :  { %v942_v52 = vadd.f32 %v1291_v46, %v1167_v49 }
 0x241   :  { %v1311_v50 = vpop.f32.mrb[8].mxu1 }
 0x242   :  { %v1312_v51 = vpop.f32.mrb[9].mxu1 }
 0x243   :  { %v1313_v53 = vadd.f32 %v1312_v51, %v1311_v50  ;;  %v1314_v54 = vpop.f32.mrb[10].mxu1 }
 0x244   :  { %v1315_v15 = vpop.f32.mrb[11].mxu1 }
 0x245   :  { %v982_v55 = vadd.f32 %v1313_v53, %v942_v52 }
 0x253   :  { %v1333_v56 = vpop.f32.mrb[12].mxu0 }
 0x254   :  { %v1334_v57 = vpop.f32.mrb[13].mxu0 }
 0x255   :  { %v1335_v58 = vadd.f32 %v1334_v57, %v1333_v56  ;;  %v1336_v59 = vpop.f32.mrb[14].mxu0 }
 0x256   :  { %v1337_v60 = vpop.f32.mrb[15].mxu0 }
 0x257   :  { %v1022_v61 = vadd.f32 %v1335_v58, %v982_v55 }
 0x259   :  { %v1027_v62 = vmax.f32 %v1022_v61, 0.0 }
 0x25b   :  { %v1028_v63 = vpack.c.bf16 %v1027_v62, %v1027_v62 }
 0x25d   :  { %1467 = vmatmul.mubr.bf16.vlgmr.msra.gmra.mrb[12].mxu1 %v1028_v63 }
 0x330   :  { %v1134_v1 = vpop.f32.mrb[12].mxu1 }
 0x331   :  { %v1135_v2 = vadd.f32 %v1216_v0, %v1134_v1  ;;  %v1468_v3 = vpop.f32.mrb[13].mxu1 }
 0x332   :  { %v1137_v4 = vpop.f32.mrb[14].mxu1 }
 0x333   :  { %1140 = vst [vmem:[#allocation2] sm:$0xff] %v1135_v2  ;;  %v1469_v5 = vpop.f32.mrb[15].mxu1 }
 0x334   :  { %1608 = shalt.err (!%p1605_p4)
}
 0x335   :  { %s1609_s5 = scalar_lea.hbm %s1972_s6, 128 }
 0x336   :  { %p1610_p5 = scmp.ne.s32.totalorder %s1972_s6, %s1609_s5  ;;  %p1613_p6 = scmp.lt.u32.totalorder %s1609_s5, %s1972_s6 }
 0x338   :  { %p1615_p7 = pnand %p1613_p6, %p1610_p5 }
 0x33a   :  { %1618 = shalt.err (!%p1615_p7)
}
 0x33b   :  { %1150 = dma.vmem_to_hbm [thread:$0]  %s1148_s21, 128, %s1972_s6, [#allocation3]  }
 0x33c   :  { %1619 = dma.done.wait [#allocation3], 128  }
 0x33d   :  { %1620 = vsyncadd [#allocation3], 4294967168 }
 0x33e   :  { %1154 = vsyncpa [#allocation3], 1 }

</bundles_post_ra>
